<compile_context>
chip_gen: v7x
topology: tpu7x:2x2x1
jax: 0.10.0
libtpu: 0.0.40
codegen_flags: <defaults>
</compile_context>

<pallas_src>
import functools
import math

import jax
import jax.numpy as jnp
from jax import lax
from jax.experimental import pallas as pl
from jax.experimental.pallas import tpu as pltpu


def _round_up(x: int, m: int) -> int:
    return ((x + m - 1) // m) * m


def make_pma_kernel(*, tb: int, n_pad: int, n_valid: int, s_pad: int, s_valid: int,
                    channels: int, num_heads: int):
    d = channels // num_heads
    scale = 1.0 / math.sqrt(channels)

    def pma_kernel(q_ref, x_ref, wkv_ref, bkv_ref, wo_ref, bo_ref, o_ref):
        # q_ref  : (s_pad, C)        precomputed Q = S @ Wq + bq (batch-invariant, hoisted)
        # x_ref  : (tb*n_pad, C)     TB batches flattened on the sublane axis
        # wkv_ref: (C, 2C) = [Wk | Wv] ; bkv_ref: (1, 2C) = [bk | bv]
        # wo_ref : (C, C)            ; bo_ref : (1, C)
        # o_ref  : (tb*s_pad, C)
        X = x_ref[...]

        # Fused K/V projection for all TB batches: one MXU pass, one bias add.
        KV = jnp.dot(X, wkv_ref[...], preferred_element_type=jnp.float32) + bkv_ref[...]
        KV3 = KV.reshape(tb, n_pad, 2 * channels)   # n_pad % 8 == 0 -> tile-aligned reshape

        Q = q_ref[...].astype(jnp.float32)           # (s_pad, C)
        Qs = Q * scale                               # fold 1/sqrt(C) into Q (one tiny mul)
        # Broadcast once (not per head): residual Q and scaled Q for the score matmuls.
        Qb = jnp.broadcast_to(Q[None], (tb, s_pad, channels))
        Qsb = jnp.broadcast_to(Qs[None], (tb, s_pad, channels))

        # Softmax is over the SEED axis -> padded seed rows must be masked out.
        if s_pad != s_valid:
            seed_ids = lax.broadcasted_iota(jnp.int32, (tb, s_pad, n_pad), 1)
            seed_neg = jnp.where(seed_ids < s_valid, 0.0, -1e30)
        else:
            seed_neg = None

        # Padded set positions must contribute nothing to A @ V -> zero their V rows.
        if n_pad != n_valid:
            n_ids = lax.broadcasted_iota(jnp.int32, (tb, n_pad, 1), 1)
            v_keep = n_ids < n_valid
        else:
            v_keep = None

        outs = []
        for h in range(num_heads):   # static unroll; each head batched over all TB batches
            lo = h * d
            Kh = KV3[:, :, lo:lo + d]                               # (tb, n_pad, d)
            Vh = KV3[:, :, channels + lo:channels + lo + d]         # (tb, n_pad, d)
            if v_keep is not None:
                Vh = jnp.where(v_keep, Vh, 0.0)

            # Contract last dims directly -- no explicit Kh.T, batched over TB.
            scores = jnp.einsum('bsd,bnd->bsn', Qsb[:, :, lo:lo + d], Kh,
                                preferred_element_type=jnp.float32)
            if seed_neg is not None:
                scores = scores + seed_neg
            # softmax over the seed/query axis (matches torch.softmax(..., dim=1))
            m = jnp.max(scores, axis=1, keepdims=True)
            e = jnp.exp(scores - m)
            A = e / jnp.sum(e, axis=1, keepdims=True)

            outs.append(Qb[:, :, lo:lo + d]
                        + jnp.einsum('bsn,bnd->bsd', A, Vh,
                                     preferred_element_type=jnp.float32))

        out = jnp.concatenate(outs, axis=-1)          # (tb, s_pad, C)
        out2 = out.reshape(tb * s_pad, channels)      # aligned collapse (s_pad % 8 == 0)

        o_fc = jnp.dot(out2, wo_ref[...], preferred_element_type=jnp.float32) + bo_ref[...]
        out2 = out2 + jnp.maximum(o_fc, 0.0)
        o_ref[...] = out2.astype(o_ref.dtype)

    return pma_kernel


def pma_forward(x, S, Wq, bq, Wk, bk, Wv, bv, Wo, bo, *, num_heads: int, batch_tile: int = 8):
    """x: (B, N, C); S: (num_seeds, C); weights (C, C) already (in, out); biases (1, C)."""
    B, N, C = x.shape
    num_seeds = S.shape[0]
    assert C % num_heads == 0

    # Hoist the batch-invariant Q projection out of the kernel (computed exactly once).
    Q = S @ Wq + bq                                      # (num_seeds, C)

    s_pad = _round_up(num_seeds, 8)
    n_pad = _round_up(N, 8)
    tb = min(batch_tile, B)
    steps = pl.cdiv(B, tb)
    b_pad = steps * tb

    if s_pad != num_seeds:
        Q = jnp.pad(Q, ((0, s_pad - num_seeds), (0, 0)))
    xp = x
    if b_pad != B or n_pad != N:
        xp = jnp.pad(x, ((0, b_pad - B), (0, n_pad - N), (0, 0)))
    x_flat = xp.reshape(b_pad * n_pad, C)                # flat view for the big fused matmul

    # Fuse the K and V projections into one matmul: [Wk | Wv] on the lane axis.
    Wkv = jnp.concatenate([Wk, Wv], axis=1)              # (C, 2C)
    bkv = jnp.concatenate([bk, bv], axis=1)              # (1, 2C)

    kernel = make_pma_kernel(tb=tb, n_pad=n_pad, n_valid=N,
                             s_pad=s_pad, s_valid=num_seeds,
                             channels=C, num_heads=num_heads)

    # Constant-index (batch-invariant) operands.
    # Note(v7x, large C): these weight specs are candidates for pipeline_mode=pl.Buffered(1)
    # to halve the double-buffered weight footprint in 64 MiB VMEM.
    def const_spec(shape):
        return pl.BlockSpec(shape, lambda i: tuple(0 for _ in shape))

    out_flat = pl.pallas_call(
        kernel,
        out_shape=jax.ShapeDtypeStruct((b_pad * s_pad, C), x.dtype),
        grid_spec=pltpu.PrefetchScalarGridSpec(
            num_scalar_prefetch=0,
            grid=(steps,),
            in_specs=[
                const_spec((s_pad, C)),                               # Q (precomputed)
                pl.BlockSpec((tb * n_pad, C), lambda i: (i, 0)),      # x, TB batches per step
                const_spec((C, 2 * C)), const_spec((1, 2 * C)),       # [Wk|Wv], [bk|bv]
                const_spec((C, C)), const_spec((1, C)),               # Wo, bo
            ],
            out_specs=pl.BlockSpec((tb * s_pad, C), lambda i: (i, 0)),
        ),
        compiler_params=pltpu.CompilerParams(
            dimension_semantics=("parallel",),            # batch-tile axis: megacore-shardable
            vmem_limit_bytes=32 * 1024 * 1024,
        ),
    )(Q, x_flat, Wkv, bkv, Wo, bo)

    return out_flat.reshape(b_pad, s_pad, C)[:B, :num_seeds, :]


def pma_reference(x, S, Wq, bq, Wk, bk, Wv, bv, Wo, bo, *, num_heads: int):
    """Pure-JAX reference mirroring the PyTorch MAB/PMA forward (mask=None)."""
    B, N, C = x.shape
    num_seeds = S.shape[0]
    d = C // num_heads
    Q = jnp.broadcast_to(S[None], (B, num_seeds, C)) @ Wq + bq          # (B, S, C)
    K = x @ Wk + bk                                                      # (B, N, C)
    V = x @ Wv + bv

    def split_heads(t):
        return jnp.concatenate([t[..., h * d:(h + 1) * d] for h in range(num_heads)], axis=0)

    Q_, K_, V_ = split_heads(Q), split_heads(K), split_heads(V)
    scores = jnp.einsum('bsd,bnd->bsn', Q_, K_) / math.sqrt(C)
    A = jax.nn.softmax(scores, axis=1)                                   # dim=1 (seed axis)
    out_ = Q_ + jnp.einsum('bsn,bnd->bsd', A, V_)
    out = jnp.concatenate([out_[h * B:(h + 1) * B] for h in range(num_heads)], axis=2)
    return out + jax.nn.relu(out @ Wo + bo)


if __name__ == "__main__":
    # Small shapes consistent with PMA(channels, num_heads, num_seeds, bias=True)
    B, N = 2, 8
    channels, num_heads, num_seeds = 32, 4, 4

    key = jax.random.PRNGKey(0)
    ks = jax.random.split(key, 11)

    # Xavier-uniform-ish seed param S (1, num_seeds, channels) -> stored as (num_seeds, channels)
    limit_S = math.sqrt(6.0 / (num_seeds + channels))
    S = jax.random.uniform(ks[0], (num_seeds, channels), jnp.float32, -limit_S, limit_S)

    def linear_params(kw, kb, fan_in, fan_out):
        lim = 1.0 / math.sqrt(fan_in)
        W = jax.random.uniform(kw, (fan_in, fan_out), jnp.float32, -lim, lim)  # (in, out)
        b = jax.random.uniform(kb, (1, fan_out), jnp.float32, -lim, lim)
        return W, b

    Wq, bq = linear_params(ks[1], ks[2], channels, channels)
    Wk, bk = linear_params(ks[3], ks[4], channels, channels)
    Wv, bv = linear_params(ks[5], ks[6], channels, channels)
    Wo, bo = linear_params(ks[7], ks[8], channels, channels)

    x = jax.random.normal(ks[9], (B, N, channels), jnp.float32)

    fwd = jax.jit(functools.partial(pma_forward, num_heads=num_heads))
    out = fwd(x, S, Wq, bq, Wk, bk, Wv, bv, Wo, bo)
    out = jax.block_until_ready(out)

    ref = pma_reference(x, S, Wq, bq, Wk, bk, Wv, bv, Wo, bo, num_heads=num_heads)
    assert out.shape == (B, num_seeds, channels)
    assert jnp.allclose(out, ref, atol=1e-4, rtol=1e-4), float(jnp.max(jnp.abs(out - ref)))

    print("KERNEL_OK")
</pallas_src>

<mosaic_0001>
module attributes {stable_mosaic.version = 11 : i64} {
  func.func @pma_kernel(%arg0: i32, %arg1: memref<8x32xf32, #tpu.memory_space<vmem>>, %arg2: memref<16x32xf32, #tpu.memory_space<vmem>>, %arg3: memref<32x64xf32, #tpu.memory_space<vmem>>, %arg4: memref<1x64xf32, #tpu.memory_space<vmem>>, %arg5: memref<32x32xf32, #tpu.memory_space<vmem>>, %arg6: memref<1x32xf32, #tpu.memory_space<vmem>>, %arg7: memref<16x32xf32, #tpu.memory_space<vmem>>) attributes {dimension_semantics = [#tpu.dimension_semantics<parallel>], iteration_bounds = array<i64: 1>, scalar_prefetch = 0 : i64, scratch_operands = 0 : i64, tpu.core_type = #tpu.core_type<tc>, window_params = [{pipeline_mode = #tpu.pipeline_mode<synchronous>, transform_indices = @transform_0, window_bounds = array<i64: 8, 32>}, {transform_indices = @transform_1, window_bounds = array<i64: 16, 32>}, {pipeline_mode = #tpu.pipeline_mode<synchronous>, transform_indices = @transform_2, window_bounds = array<i64: 32, 64>}, {pipeline_mode = #tpu.pipeline_mode<synchronous>, transform_indices = @transform_3, window_bounds = array<i64: 1, 64>}, {pipeline_mode = #tpu.pipeline_mode<synchronous>, transform_indices = @transform_4, window_bounds = array<i64: 32, 32>}, {pipeline_mode = #tpu.pipeline_mode<synchronous>, transform_indices = @transform_5, window_bounds = array<i64: 1, 32>}, {transform_indices = @transform_6, window_bounds = array<i64: 16, 32>}]} {
    %c0 = arith.constant 0 : index
    %c0_0 = arith.constant 0 : index
    %0 = vector.load %arg2[%c0, %c0_0] : memref<16x32xf32, #tpu.memory_space<vmem>>, vector<16x32xf32>
    %c0_1 = arith.constant 0 : index
    %c0_2 = arith.constant 0 : index
    %1 = vector.load %arg3[%c0_1, %c0_2] : memref<32x64xf32, #tpu.memory_space<vmem>>, vector<32x64xf32>
    %cst = arith.constant dense<0.000000e+00> : vector<16x64xf32>
    %2 = tpu.matmul %0, %1, %cst {dimension_numbers = #tpu.dot_dimension_numbers<[1], [0], [0], [1], [0, 0, 1, 1], [], []>} : vector<16x32xf32>, vector<32x64xf32>, vector<16x64xf32> -> vector<16x64xf32>
    %c0_3 = arith.constant 0 : index
    %c0_4 = arith.constant 0 : index
    %3 = vector.load %arg4[%c0_3, %c0_4] : memref<1x64xf32, #tpu.memory_space<vmem>>, vector<1x64xf32>
    %4 = vector.broadcast %3 : vector<1x64xf32> to vector<16x64xf32>
    %5 = arith.addf %2, %4 : vector<16x64xf32>
    %6 = vector.shape_cast %5 : vector<16x64xf32> to vector<2x8x64xf32>
    %c0_5 = arith.constant 0 : index
    %c0_6 = arith.constant 0 : index
    %7 = vector.load %arg1[%c0_5, %c0_6] : memref<8x32xf32, #tpu.memory_space<vmem>>, vector<8x32xf32>
    %cst_7 = arith.constant 0.176776692 : f32
    %8 = vector.broadcast %cst_7 : f32 to vector<8x32xf32>
    %9 = arith.mulf %7, %8 : vector<8x32xf32>
    %10 = vector.shape_cast %7 : vector<8x32xf32> to vector<1x8x32xf32>
    %11 = vector.shape_cast %10 : vector<1x8x32xf32> to vector<1x8x32xf32>
    %12 = vector.broadcast %11 : vector<1x8x32xf32> to vector<2x8x32xf32>
    %13 = vector.shape_cast %9 : vector<8x32xf32> to vector<1x8x32xf32>
    %14 = vector.shape_cast %13 : vector<1x8x32xf32> to vector<1x8x32xf32>
    %15 = vector.broadcast %14 : vector<1x8x32xf32> to vector<2x8x32xf32>
    %16 = tpu.iota {dimensions = array<i32: 1>} : vector<2x8x8xi32>
    %c4_i32 = arith.constant 4 : i32
    %17 = vector.broadcast %c4_i32 : i32 to vector<2x8x8xi32>
    %18 = arith.cmpi slt, %16, %17 : vector<2x8x8xi32>
    %cst_8 = arith.constant 0.000000e+00 : f32
    %cst_9 = arith.constant -1.000000e+30 : f32
    %19 = vector.broadcast %cst_8 : f32 to vector<2x8x8xf32>
    %20 = vector.broadcast %cst_9 : f32 to vector<2x8x8xf32>
    %21 = arith.select %18, %19, %20 : vector<2x8x8xi1>, vector<2x8x8xf32>
    %22 = vector.extract_strided_slice %6 {offsets = [0, 0, 0], sizes = [2, 8, 8], strides = [1, 1, 1]} : vector<2x8x64xf32> to vector<2x8x8xf32>
    %23 = vector.extract_strided_slice %6 {offsets = [0, 0, 32], sizes = [2, 8, 8], strides = [1, 1, 1]} : vector<2x8x64xf32> to vector<2x8x8xf32>
    %24 = vector.extract_strided_slice %15 {offsets = [0, 0, 0], sizes = [2, 8, 8], strides = [1, 1, 1]} : vector<2x8x32xf32> to vector<2x8x8xf32>
    "tpu.trace_start"() <{level = 10 : i32, message = "bsd,bnd->bsn"}> : () -> ()
    %cst_10 = arith.constant dense<0.000000e+00> : vector<2x8x8xf32>
    %25 = tpu.matmul %24, %22, %cst_10 {dimension_numbers = #tpu.dot_dimension_numbers<[2], [2], [1], [1], [0, 0, 0, 1, 1, 1], [0], [0]>} : vector<2x8x8xf32>, vector<2x8x8xf32>, vector<2x8x8xf32> -> vector<2x8x8xf32>
    "tpu.trace_stop"() : () -> ()
    %26 = arith.addf %25, %21 : vector<2x8x8xf32>
    %cst_11 = arith.constant dense<0xFF800000> : vector<2x8xf32>
    %27 = vector.multi_reduction <maximumf>, %26, %cst_11 [1] : vector<2x8x8xf32> to vector<2x8xf32>
    %28 = vector.shape_cast %27 : vector<2x8xf32> to vector<2x1x8xf32>
    %29 = vector.broadcast %28 : vector<2x1x8xf32> to vector<2x8x8xf32>
    %30 = arith.subf %26, %29 : vector<2x8x8xf32>
    %31 = math.exp %30 : vector<2x8x8xf32>
    %cst_12 = arith.constant dense<0.000000e+00> : vector<2x8xf32>
    %32 = vector.multi_reduction <add>, %31, %cst_12 [1] : vector<2x8x8xf32> to vector<2x8xf32>
    %33 = vector.shape_cast %32 : vector<2x8xf32> to vector<2x1x8xf32>
    %34 = vector.broadcast %33 : vector<2x1x8xf32> to vector<2x8x8xf32>
    %35 = arith.divf %31, %34 : vector<2x8x8xf32>
    %36 = vector.extract_strided_slice %12 {offsets = [0, 0, 0], sizes = [2, 8, 8], strides = [1, 1, 1]} : vector<2x8x32xf32> to vector<2x8x8xf32>
    "tpu.trace_start"() <{level = 10 : i32, message = "bsn,bnd->bsd"}> : () -> ()
    %cst_13 = arith.constant dense<0.000000e+00> : vector<2x8x8xf32>
    %37 = tpu.matmul %35, %23, %cst_13 {dimension_numbers = #tpu.dot_dimension_numbers<[2], [1], [1], [2], [0, 0, 0, 1, 1, 2], [0], [0]>} : vector<2x8x8xf32>, vector<2x8x8xf32>, vector<2x8x8xf32> -> vector<2x8x8xf32>
    "tpu.trace_stop"() : () -> ()
    %38 = arith.addf %36, %37 : vector<2x8x8xf32>
    %39 = vector.extract_strided_slice %6 {offsets = [0, 0, 8], sizes = [2, 8, 8], strides = [1, 1, 1]} : vector<2x8x64xf32> to vector<2x8x8xf32>
    %40 = vector.extract_strided_slice %6 {offsets = [0, 0, 40], sizes = [2, 8, 8], strides = [1, 1, 1]} : vector<2x8x64xf32> to vector<2x8x8xf32>
    %41 = vector.extract_strided_slice %15 {offsets = [0, 0, 8], sizes = [2, 8, 8], strides = [1, 1, 1]} : vector<2x8x32xf32> to vector<2x8x8xf32>
    "tpu.trace_start"() <{level = 10 : i32, message = "bsd,bnd->bsn"}> : () -> ()
    %cst_14 = arith.constant dense<0.000000e+00> : vector<2x8x8xf32>
    %42 = tpu.matmul %41, %39, %cst_14 {dimension_numbers = #tpu.dot_dimension_numbers<[2], [2], [1], [1], [0, 0, 0, 1, 1, 1], [0], [0]>} : vector<2x8x8xf32>, vector<2x8x8xf32>, vector<2x8x8xf32> -> vector<2x8x8xf32>
    "tpu.trace_stop"() : () -> ()
    %43 = arith.addf %42, %21 : vector<2x8x8xf32>
    %cst_15 = arith.constant dense<0xFF800000> : vector<2x8xf32>
    %44 = vector.multi_reduction <maximumf>, %43, %cst_15 [1] : vector<2x8x8xf32> to vector<2x8xf32>
    %45 = vector.shape_cast %44 : vector<2x8xf32> to vector<2x1x8xf32>
    %46 = vector.broadcast %45 : vector<2x1x8xf32> to vector<2x8x8xf32>
    %47 = arith.subf %43, %46 : vector<2x8x8xf32>
    %48 = math.exp %47 : vector<2x8x8xf32>
    %cst_16 = arith.constant dense<0.000000e+00> : vector<2x8xf32>
    %49 = vector.multi_reduction <add>, %48, %cst_16 [1] : vector<2x8x8xf32> to vector<2x8xf32>
    %50 = vector.shape_cast %49 : vector<2x8xf32> to vector<2x1x8xf32>
    %51 = vector.broadcast %50 : vector<2x1x8xf32> to vector<2x8x8xf32>
    %52 = arith.divf %48, %51 : vector<2x8x8xf32>
    %53 = vector.extract_strided_slice %12 {offsets = [0, 0, 8], sizes = [2, 8, 8], strides = [1, 1, 1]} : vector<2x8x32xf32> to vector<2x8x8xf32>
    "tpu.trace_start"() <{level = 10 : i32, message = "bsn,bnd->bsd"}> : () -> ()
    %cst_17 = arith.constant dense<0.000000e+00> : vector<2x8x8xf32>
    %54 = tpu.matmul %52, %40, %cst_17 {dimension_numbers = #tpu.dot_dimension_numbers<[2], [1], [1], [2], [0, 0, 0, 1, 1, 2], [0], [0]>} : vector<2x8x8xf32>, vector<2x8x8xf32>, vector<2x8x8xf32> -> vector<2x8x8xf32>
    "tpu.trace_stop"() : () -> ()
    %55 = arith.addf %53, %54 : vector<2x8x8xf32>
    %56 = vector.extract_strided_slice %6 {offsets = [0, 0, 16], sizes = [2, 8, 8], strides = [1, 1, 1]} : vector<2x8x64xf32> to vector<2x8x8xf32>
    %57 = vector.extract_strided_slice %6 {offsets = [0, 0, 48], sizes = [2, 8, 8], strides = [1, 1, 1]} : vector<2x8x64xf32> to vector<2x8x8xf32>
    %58 = vector.extract_strided_slice %15 {offsets = [0, 0, 16], sizes = [2, 8, 8], strides = [1, 1, 1]} : vector<2x8x32xf32> to vector<2x8x8xf32>
    "tpu.trace_start"() <{level = 10 : i32, message = "bsd,bnd->bsn"}> : () -> ()
    %cst_18 = arith.constant dense<0.000000e+00> : vector<2x8x8xf32>
    %59 = tpu.matmul %58, %56, %cst_18 {dimension_numbers = #tpu.dot_dimension_numbers<[2], [2], [1], [1], [0, 0, 0, 1, 1, 1], [0], [0]>} : vector<2x8x8xf32>, vector<2x8x8xf32>, vector<2x8x8xf32> -> vector<2x8x8xf32>
    "tpu.trace_stop"() : () -> ()
    %60 = arith.addf %59, %21 : vector<2x8x8xf32>
    %cst_19 = arith.constant dense<0xFF800000> : vector<2x8xf32>
    %61 = vector.multi_reduction <maximumf>, %60, %cst_19 [1] : vector<2x8x8xf32> to vector<2x8xf32>
    %62 = vector.shape_cast %61 : vector<2x8xf32> to vector<2x1x8xf32>
    %63 = vector.broadcast %62 : vector<2x1x8xf32> to vector<2x8x8xf32>
    %64 = arith.subf %60, %63 : vector<2x8x8xf32>
    %65 = math.exp %64 : vector<2x8x8xf32>
    %cst_20 = arith.constant dense<0.000000e+00> : vector<2x8xf32>
    %66 = vector.multi_reduction <add>, %65, %cst_20 [1] : vector<2x8x8xf32> to vector<2x8xf32>
    %67 = vector.shape_cast %66 : vector<2x8xf32> to vector<2x1x8xf32>
    %68 = vector.broadcast %67 : vector<2x1x8xf32> to vector<2x8x8xf32>
    %69 = arith.divf %65, %68 : vector<2x8x8xf32>
    %70 = vector.extract_strided_slice %12 {offsets = [0, 0, 16], sizes = [2, 8, 8], strides = [1, 1, 1]} : vector<2x8x32xf32> to vector<2x8x8xf32>
    "tpu.trace_start"() <{level = 10 : i32, message = "bsn,bnd->bsd"}> : () -> ()
    %cst_21 = arith.constant dense<0.000000e+00> : vector<2x8x8xf32>
    %71 = tpu.matmul %69, %57, %cst_21 {dimension_numbers = #tpu.dot_dimension_numbers<[2], [1], [1], [2], [0, 0, 0, 1, 1, 2], [0], [0]>} : vector<2x8x8xf32>, vector<2x8x8xf32>, vector<2x8x8xf32> -> vector<2x8x8xf32>
    "tpu.trace_stop"() : () -> ()
    %72 = arith.addf %70, %71 : vector<2x8x8xf32>
    %73 = vector.extract_strided_slice %6 {offsets = [0, 0, 24], sizes = [2, 8, 8], strides = [1, 1, 1]} : vector<2x8x64xf32> to vector<2x8x8xf32>
    %74 = vector.extract_strided_slice %6 {offsets = [0, 0, 56], sizes = [2, 8, 8], strides = [1, 1, 1]} : vector<2x8x64xf32> to vector<2x8x8xf32>
    %75 = vector.extract_strided_slice %15 {offsets = [0, 0, 24], sizes = [2, 8, 8], strides = [1, 1, 1]} : vector<2x8x32xf32> to vector<2x8x8xf32>
    "tpu.trace_start"() <{level = 10 : i32, message = "bsd,bnd->bsn"}> : () -> ()
    %cst_22 = arith.constant dense<0.000000e+00> : vector<2x8x8xf32>
    %76 = tpu.matmul %75, %73, %cst_22 {dimension_numbers = #tpu.dot_dimension_numbers<[2], [2], [1], [1], [0, 0, 0, 1, 1, 1], [0], [0]>} : vector<2x8x8xf32>, vector<2x8x8xf32>, vector<2x8x8xf32> -> vector<2x8x8xf32>
    "tpu.trace_stop"() : () -> ()
    %77 = arith.addf %76, %21 : vector<2x8x8xf32>
    %cst_23 = arith.constant dense<0xFF800000> : vector<2x8xf32>
    %78 = vector.multi_reduction <maximumf>, %77, %cst_23 [1] : vector<2x8x8xf32> to vector<2x8xf32>
    %79 = vector.shape_cast %78 : vector<2x8xf32> to vector<2x1x8xf32>
    %80 = vector.broadcast %79 : vector<2x1x8xf32> to vector<2x8x8xf32>
    %81 = arith.subf %77, %80 : vector<2x8x8xf32>
    %82 = math.exp %81 : vector<2x8x8xf32>
    %cst_24 = arith.constant dense<0.000000e+00> : vector<2x8xf32>
    %83 = vector.multi_reduction <add>, %82, %cst_24 [1] : vector<2x8x8xf32> to vector<2x8xf32>
    %84 = vector.shape_cast %83 : vector<2x8xf32> to vector<2x1x8xf32>
    %85 = vector.broadcast %84 : vector<2x1x8xf32> to vector<2x8x8xf32>
    %86 = arith.divf %82, %85 : vector<2x8x8xf32>
    %87 = vector.extract_strided_slice %12 {offsets = [0, 0, 24], sizes = [2, 8, 8], strides = [1, 1, 1]} : vector<2x8x32xf32> to vector<2x8x8xf32>
    "tpu.trace_start"() <{level = 10 : i32, message = "bsn,bnd->bsd"}> : () -> ()
    %cst_25 = arith.constant dense<0.000000e+00> : vector<2x8x8xf32>
    %88 = tpu.matmul %86, %74, %cst_25 {dimension_numbers = #tpu.dot_dimension_numbers<[2], [1], [1], [2], [0, 0, 0, 1, 1, 2], [0], [0]>} : vector<2x8x8xf32>, vector<2x8x8xf32>, vector<2x8x8xf32> -> vector<2x8x8xf32>
    "tpu.trace_stop"() : () -> ()
    %89 = arith.addf %87, %88 : vector<2x8x8xf32>
    %90 = tpu.concatenate %38, %55, %72, %89 in 2 : vector<2x8x8xf32>, vector<2x8x8xf32>, vector<2x8x8xf32>, vector<2x8x8xf32> -> vector<2x8x32xf32>
    %91 = vector.shape_cast %90 : vector<2x8x32xf32> to vector<16x32xf32>
    %c0_26 = arith.constant 0 : index
    %c0_27 = arith.constant 0 : index
    %92 = vector.load %arg5[%c0_26, %c0_27] : memref<32x32xf32, #tpu.memory_space<vmem>>, vector<32x32xf32>
    %cst_28 = arith.constant dense<0.000000e+00> : vector<16x32xf32>
    %93 = tpu.matmul %91, %92, %cst_28 {dimension_numbers = #tpu.dot_dimension_numbers<[1], [0], [0], [1], [0, 0, 1, 1], [], []>} : vector<16x32xf32>, vector<32x32xf32>, vector<16x32xf32> -> vector<16x32xf32>
    %c0_29 = arith.constant 0 : index
    %c0_30 = arith.constant 0 : index
    %94 = vector.load %arg6[%c0_29, %c0_30] : memref<1x32xf32, #tpu.memory_space<vmem>>, vector<1x32xf32>
    %95 = vector.broadcast %94 : vector<1x32xf32> to vector<16x32xf32>
    %96 = arith.addf %93, %95 : vector<16x32xf32>
    %cst_31 = arith.constant 0.000000e+00 : f32
    %97 = vector.broadcast %cst_31 : f32 to vector<16x32xf32>
    %98 = arith.maximumf %96, %97 : vector<16x32xf32>
    %99 = arith.addf %91, %98 : vector<16x32xf32>
    %c0_32 = arith.constant 0 : index
    %c0_33 = arith.constant 0 : index
    %100 = vector.load %arg7[%c0_32, %c0_33] : memref<16x32xf32, #tpu.memory_space<vmem>>, vector<16x32xf32>
    tpu.vector_store %arg7[%c0_32, %c0_33], %99 {strides = array<i32>} : memref<16x32xf32, #tpu.memory_space<vmem>>, vector<16x32xf32>,
    return
  }
  func.func @transform_0(%arg0: i32) -> (i32, i32) {
    %c0_i32 = arith.constant 0 : i32
    %c0_i32_0 = arith.constant 0 : i32
    %c0_i32_1 = arith.constant 0 : i32
    return %c0_i32, %c0_i32_0 : i32, i32
  }
  func.func @transform_1(%arg0: i32) -> (i32, i32) {
    %c0_i32 = arith.constant 0 : i32
    %c0_i32_0 = arith.constant 0 : i32
    return %arg0, %c0_i32 : i32, i32
  }
  func.func @transform_2(%arg0: i32) -> (i32, i32) {
    %c0_i32 = arith.constant 0 : i32
    %c0_i32_0 = arith.constant 0 : i32
    %c0_i32_1 = arith.constant 0 : i32
    return %c0_i32, %c0_i32_0 : i32, i32
  }
  func.func @transform_3(%arg0: i32) -> (i32, i32) {
    %c0_i32 = arith.constant 0 : i32
    %c0_i32_0 = arith.constant 0 : i32
    %c0_i32_1 = arith.constant 0 : i32
    return %c0_i32, %c0_i32_0 : i32, i32
  }
  func.func @transform_4(%arg0: i32) -> (i32, i32) {
    %c0_i32 = arith.constant 0 : i32
    %c0_i32_0 = arith.constant 0 : i32
    %c0_i32_1 = arith.constant 0 : i32
    return %c0_i32, %c0_i32_0 : i32, i32
  }
  func.func @transform_5(%arg0: i32) -> (i32, i32) {
    %c0_i32 = arith.constant 0 : i32
    %c0_i32_0 = arith.constant 0 : i32
    %c0_i32_1 = arith.constant 0 : i32
    return %c0_i32, %c0_i32_0 : i32, i32
  }
  func.func @transform_6(%arg0: i32) -> (i32, i32) {
    %c0_i32 = arith.constant 0 : i32
    %c0_i32_0 = arith.constant 0 : i32
    return %arg0, %c0_i32 : i32, i32
  }
}

</mosaic_0001>

<bundles_post_ra>
// kernel: pma_forward.1
= control target key start
LH: loop header
LB: loop body
LE: loop exit
PB: predicated region body
PF: predicated region fallthrough
CT: control target
= control target key end

     0   :  { %vm36_vm0 = vcmask 261120   ;;  %v1869_v8 = vmov 0.0   ;;  %vm1870_vm1 = vmmov 0   ;;  %vm124_vm2 = vcmask 64512   ;;  %s1871_s11 = smov 120   ;;  %s1872_s12 = smov 96   ;;  %s2098_s2 = inlined_call_operand.vmem [shape: f32[32,64], index: 2, kind: input, shape index: {}]   ;;  %s2099_s1 = inlined_call_operand.vmem [shape: f32[16,32], index: 1, kind: input, shape index: {}]   ;;  %s2100_s3 = inlined_call_operand.vmem [shape: f32[1,64], index: 3, kind: input, shape index: {}]   ;;  %s2101_s0 = inlined_call_operand.vmem [shape: f32[8,32], index: 0, kind: input, shape index: {}]   ;;  %s2102_s4 = inlined_call_operand.vmem [shape: f32[32,32], index: 4, kind: input, shape index: {}]   ;;  %s2103_s5 = inlined_call_operand.vmem [shape: f32[1,32], index: 5, kind: input, shape index: {}]   ;;  %s2104_s6 = inlined_call_operand.vmem [shape: f32[16,32], index: 6, kind: output, shape index: {}]  }
   0x1   :  { %v25_v0 = vld [vmem:[%s2098_s2] sm:$0xff]  ;;  %v26_v1 = vld [vmem:[%s2098_s2 + $0x8] sm:$0xff]  ;;  %v27_v2 = vld [vmem:[%s2098_s2 + $0x10] sm:$0xff]  ;;  %1717 = vmatprep.subr.mxu1 %v1869_v8  ;;  %1719 = vmatprep.mubr.msk.f32.mxu1 %vm1870_vm1, %v1869_v8  ;;  %s1875_s13 = smov 80   ;;  %s1876_s14 = smov 104   ;;  %v120_v22 = vlaneseq  ;;  %vm1524_vm4 = vcmask 130048  }
   0x2   :  { %v1808_v3 = vpack.c.bf16 %v26_v1, %v25_v0  ;;  %v28_v4 = vld [vmem:[%s2098_s2 + $0x18] sm:$0xff]  ;;  %v23_v5 = vld [vmem:[%s2099_s1] sm:$0xff]  ;;  %v24_v7 = vld [vmem:[%s2099_s1 + $0x8] sm:$0xff]  ;;  %s1877_s15 = smov 72   ;;  %v1878_v24 = vmov -1e+30  }
   0x3   :  { %v1812_v6 = vpack.c.bf16 %v28_v4, %v27_v2  ;;  %1714 = vmatprep.mubr.msk.f32.mxu0 %vm36_vm0, %v23_v5  ;;  %v1632_v9 = vld [vmem:[%s2100_s3] ss:$0 sm:$0xff]  ;;  %s1874_s3 = smov 112   ;;  %v121_v23 = vshrl.u32 %v120_v22, 7  ;;  %s1879_s16 = smov 8   ;;  %vm1527_vm5 = vcmask 195584  }
   0x4   :  { %1809 = vmatprep.subr.bf16.mxu0 %v1808_v3  ;;  %v1949_v12 = vld [vmem:[%s2101_s0] sm:$0xff]  ;;  %s1873_s0 = smov 88   ;;  %s1880_s17 = smov 16  }
   0x5   :  { %1811 = vmatpush3.bf16.msra.mxu0 %v1808_v3  ;;  %v119_v14 = vmul.f32 0.17677669, %v1949_v12  ;;  %vm122_vm3 = vcmp.lt.s32.totalorder %v121_v23, 4  ;;  %s1881_s18 = smov 24  }
   0x6   :  { %1813 = vmatprep.subr.bf16.mxu0 %v1812_v6  ;;  %v1974_v25 = vsel %vm122_vm3, 0.0, %v1878_v24 }
   0x9   :  { %1815 = vmatpush3.bf16.msra.mxu0 %v1812_v6 }
   0xa   :  { %1737 = vmatprep.subr.mxu0 %v1869_v8 }
   0xc   :  { %1715 = vmatmul.mubr.msk.f32.vlgmr.msra.gmra.mrb[0].mxu0 %vm36_vm0, %v24_v7 }
   0xd   :  { %1739 = vmatprep.mubr.msk.f32.mxu0 %vm1870_vm1, %v1869_v8 }
  0xdf   :  { %v1716_v10 = vpop.f32.mrb[0].mxu0 }
  0xe0   :  { %v109_v11 = vpop.f32.mrb[1].mxu0  ;;  %v115_v15 = vadd.f32 %v1716_v10, %v1632_v9 }
  0xe1   :  { %v110_v13 = vadd.f32 %v1632_v9, %v109_v11 }
  0xe3   :  { %468 = vrot.lane.b32.xlu1 %v110_v13, %s1871_s11  ;;  %312 = vrot.lane.b32.xlu0 %v110_v13, %s1872_s12 }
  0xe4   :  { %1718 = vmatpush3.xpose.msk.msra.mxu1 %vm124_vm2, %v110_v13 }
  0xe5   :  { %1722 = vmatprep.subr.mxu1 %v1869_v8 }
  0xe7   :  { %1720 = vmatmul.mubr.msk.f32.vlgmr.msra.gmra.mrb[0].mxu1 %vm124_vm2, %v119_v14  ;;  %544 = vrot.lane.b32.xlu1 %v115_v15, %s1871_s11 }
  0xe8   :  { %388 = vrot.lane.b32.xlu0 %v115_v15, %s1872_s12  ;;  %1723 = vmatpush3.xpose.msk.msra.mxu1 %vm124_vm2, %v115_v15 }
  0xe9   :  { %1724 = vmatprep.mubr.msk.f32.mxu1 %vm1870_vm1, %v1869_v8  ;;  %1727 = vmatprep.subr.mxu1 %v1869_v8 }
  0xeb   :  { %1725 = vmatmul.mubr.msk.f32.vlgmr.msra.gmra.mrb[2].mxu1 %vm124_vm2, %v119_v14  ;;  %656 = vrot.lane.b32.xlu1 %v110_v13, %s1873_s0 }
  0xec   :  { %466 = vrot.lane.b32.xlu0 %v119_v14, %s1871_s11  ;;  %1729 = vmatprep.mubr.msk.f32.mxu1 %vm1870_vm1, %v1869_v8 }
  0xef   :  { %820 = vrot.lane.b32.xlu1 %v110_v13, %s1874_s3 }
  0xf0   :  { %732 = vrot.lane.b32.xlu0 %v115_v15, %s1873_s0 }
  0xf3   :  { %818 = vrot.lane.b32.xlu1 %v119_v14, %s1874_s3 }
  0xf4   :  { %896 = vrot.lane.b32.xlu0 %v115_v15, %s1874_s3 }
  0xf7   :  { %1084 = vrot.lane.b32.xlu1 %v115_v15, %s1875_s13 }
  0xf8   :  { %1008 = vrot.lane.b32.xlu0 %v110_v13, %s1875_s13 }
  0xfb   :  { %1248 = vrot.lane.b32.xlu1 %v115_v15, %s1876_s14 }
  0xfc   :  { %1172 = vrot.lane.b32.xlu0 %v110_v13, %s1876_s14 }
  0xff   :  { %1360 = vrot.lane.b32.xlu1 %v110_v13, %s1877_s15 }
 0x100   :  { %1170 = vrot.lane.b32.xlu0 %v119_v14, %s1876_s14 }
 0x104   :  { %1436 = vrot.lane.b32.xlu0 %v115_v15, %s1877_s15 }
 0x155   :  { %v469_v16 = vpop.permute.xlu1 %468  ;;  %v313_v17 = vpop.permute.xlu0 %312 }
 0x156   :  { %1728 = vmatpush3.msra.mxu1 %v313_v17  ;;  %1738 = vmatpush3.xpose.msk.msra.mxu0 %vm124_vm2, %v469_v16 }
 0x157   :  { %1747 = vmatprep.subr.mxu0 %v1869_v8  ;;  %1732 = vmatprep.subr.mxu1 %v1869_v8 }
 0x159   :  { %v1965_v18 = vpop.permute.xlu1 %544 }
 0x15a   :  { %v389_v19 = vpop.permute.xlu0 %388 }
 0x15d   :  { %v657_v20 = vpop.permute.xlu1 %656 }
 0x15e   :  { %v1967_v21 = vpop.permute.xlu0 %466 }
 0x15f   :  { %1740 = vmatmul.mubr.msk.f32.vlgmr.msra.gmra.mrb[2].mxu0 %vm124_vm2, %v1967_v21 }
 0x160   :  { %1748 = vmatpush3.msra.mxu0 %v657_v20  ;;  %1749 = vmatprep.mubr.msk.f32.mxu0 %vm1870_vm1, %v1869_v8 }
 0x161   :  { %1757 = vmatprep.subr.mxu0 %v1869_v8 }
 0x162   :  { %v733_v6 = vpop.permute.xlu0 %732 }
 0x1ba   :  { %v197_v26 = vpop.f32.mrb[0].mxu1 }
 0x1bb   :  { %v198_v27 = vadd.f32 %v197_v26, %v1974_v25  ;;  %v1721_v28 = vpop.f32.mrb[1].mxu1 }
 0x1bd   :  { %v274_v29 = vsel %vm124_vm2, %v198_v27, -inf }
 0x1be   :  { %v275_v30 = vrot.slane %v274_v29, 4  ;;  %v270_v31 = vpop.f32.mrb[2].mxu1 }
 0x1bf   :  { %v271_v32 = vadd.f32 %v270_v31, %v1974_v25  ;;  %v1726_v33 = vpop.f32.mrb[3].mxu1  ;;  %v821_v31 = vpop.permute.xlu1 %820 }
 0x1c0   :  { %v276_v34 = vmax.f32 %v274_v29, %v275_v30 }
 0x1c1   :  { %v281_v35 = vsel %vm124_vm2, %v271_v32, -inf }
 0x1c2   :  { %v277_v36 = vrot.slane %v276_v34, 2  ;;  %v282_v37 = vrot.slane %v281_v35, 4 }
 0x1c4   :  { %v278_v38 = vmax.f32 %v276_v34, %v277_v36  ;;  %v283_v39 = vmax.f32 %v281_v35, %v282_v37  ;;  %v819_v34 = vpop.permute.xlu1 %818 }
 0x1c6   :  { %v279_v40 = vrot.slane %v278_v38, 1  ;;  %v284_v41 = vrot.slane %v283_v39, 2 }
 0x1c8   :  { %v280_v42 = vmax.f32 %v278_v38, %v279_v40  ;;  %v285_v43 = vmax.f32 %v283_v39, %v284_v41 }
 0x1ca   :  { %v288_v44 = vsub.f32 %v198_v27, %v280_v42  ;;  %v286_v45 = vrot.slane %v285_v43, 1 }
 0x1cc   :  { %v290_v46 = vmul.f32 1.442695, %v288_v44  ;;  %v287_v47 = vmax.f32 %v285_v43, %v286_v45 }
 0x1ce   :  { %1837 = vpow2.f32 %v290_v46  ;;  %v289_v48 = vsub.f32 %v271_v32, %v287_v47  ;;  %v897_v32 = vpop.permute.xlu0 %896 }
 0x1d0   :  { %v292_v49 = vmul.f32 1.442695, %v289_v48 }
 0x1d2   :  { %1839 = vpow2.f32 %v292_v49  ;;  %v1009_v35 = vpop.permute.xlu0 %1008 }
 0x1d8   :  { %v1838_v50 = vpop.eup %1837 }
 0x1d9   :  { %v294_v51 = vsel %vm124_vm2, %v1838_v50, 0.0 }
 0x1da   :  { %v295_v52 = vrot.slane %v294_v51, 4 }
 0x1dc   :  { %v1840_v53 = vpop.eup %1839  ;;  %v296_v54 = vadd.f32 %v295_v52, %v294_v51 }
 0x1dd   :  { %v301_v55 = vsel %vm124_vm2, %v1840_v53, 0.0 }
 0x1de   :  { %v297_v56 = vrot.slane %v296_v54, 2  ;;  %v302_v57 = vrot.slane %v301_v55, 4 }
 0x1e0   :  { %v298_v58 = vadd.f32 %v297_v56, %v296_v54  ;;  %v303_v59 = vadd.f32 %v302_v57, %v301_v55 }
 0x1e2   :  { %v299_v60 = vrot.slane %v298_v58, 1  ;;  %v304_v61 = vrot.slane %v303_v59, 2 }
 0x1e4   :  { %v300_v62 = vadd.f32 %v299_v60, %v298_v58  ;;  %v305_v63 = vadd.f32 %v304_v61, %v303_v59 }
 0x1e6   :  { %1841 = vrcp.f32 %v300_v62  ;;  %v306_v0 = vrot.slane %v305_v63, 1  ;;  %v1085_v62 = vpop.permute.xlu1 %1084 }
 0x1e8   :  { %v307_v1 = vadd.f32 %v306_v0, %v305_v63 }
 0x1ea   :  { %1843 = vrcp.f32 %v307_v1 }
 0x1f0   :  { %v1842_v2 = vpop.eup %1841 }
 0x1f1   :  { %v309_v3 = vmul.f32 %v1842_v2, %v1838_v50 }
 0x1f3   :  { %1730 = vmatmul.mubr.msk.f32.vlgmr.msra.gmra.mrb[4].mxu1 %vm124_vm2, %v309_v3 }
 0x1f4   :  { %v1844_v4 = vpop.eup %1843  ;;  %1733 = vmatpush3.msra.mxu1 %v389_v19  ;;  %1734 = vmatprep.mubr.msk.f32.mxu1 %vm1870_vm1, %v1869_v8 }
 0x1f5   :  { %v311_v5 = vmul.f32 %v1844_v4, %v1840_v53  ;;  %1742 = vmatprep.subr.mxu1 %v1869_v8 }
 0x1f7   :  { %1735 = vmatmul.mubr.msk.f32.vlgmr.msra.gmra.mrb[6].mxu1 %vm124_vm2, %v311_v5 }
 0x1f8   :  { %1744 = vmatprep.mubr.msk.f32.mxu1 %vm1870_vm1, %v1869_v8 }
 0x1fb   :  { %1743 = vmatpush3.xpose.msk.msra.mxu1 %vm124_vm2, %v1965_v18 }
 0x1fc   :  { %1752 = vmatprep.subr.mxu1 %v1869_v8 }
 0x1fe   :  { %1745 = vmatmul.mubr.msk.f32.vlgmr.msra.gmra.mrb[8].mxu1 %vm124_vm2, %v1967_v21 }
 0x1ff   :  { %1753 = vmatpush3.msra.mxu1 %v733_v6  ;;  %1754 = vmatprep.mubr.msk.f32.mxu1 %vm1870_vm1, %v1869_v8 }
 0x200   :  { %1762 = vmatprep.subr.mxu1 %v1869_v8 }
 0x232   :  { %v540_v7 = vpop.f32.mrb[2].mxu0 }
 0x233   :  { %v541_v9 = vadd.f32 %v540_v7, %v1974_v25  ;;  %v1741_v10 = vpop.f32.mrb[3].mxu0 }
 0x235   :  { %v618_v11 = vsel %vm124_vm2, %v541_v9, -inf }
 0x236   :  { %v619_v13 = vrot.slane %v618_v11, 4 }
 0x238   :  { %v620_v14 = vmax.f32 %v618_v11, %v619_v13 }
 0x23a   :  { %v621_v15 = vrot.slane %v620_v14, 2 }
 0x23c   :  { %v622_v16 = vmax.f32 %v620_v14, %v621_v15 }
 0x23e   :  { %v623_v17 = vrot.slane %v622_v16, 1 }
 0x240   :  { %v624_v18 = vmax.f32 %v622_v16, %v623_v17 }
 0x242   :  { %v632_v19 = vsub.f32 %v541_v9, %v624_v18 }
 0x244   :  { %v634_v20 = vmul.f32 1.442695, %v632_v19 }
 0x246   :  { %1845 = vpow2.f32 %v634_v20 }
 0x250   :  { %v1846_v21 = vpop.eup %1845 }
 0x251   :  { %v638_v22 = vsel %vm124_vm2, %v1846_v21, 0.0 }
 0x252   :  { %v639_v23 = vrot.slane %v638_v22, 4 }
 0x254   :  { %v640_v24 = vadd.f32 %v639_v23, %v638_v22 }
 0x256   :  { %v641_v26 = vrot.slane %v640_v24, 2 }
 0x258   :  { %v642_v27 = vadd.f32 %v641_v26, %v640_v24  ;;  %v1173_v24 = vpop.permute.xlu0 %1172  ;;  %v1249_v26 = vpop.permute.xlu1 %1248 }
 0x25a   :  { %v643_v28 = vrot.slane %v642_v27, 1 }
 0x25c   :  { %v644_v29 = vadd.f32 %v643_v28, %v642_v27  ;;  %v1171_v28 = vpop.permute.xlu0 %1170 }
 0x25e   :  { %1847 = vrcp.f32 %v644_v29  ;;  %v1361_v29 = vpop.permute.xlu1 %1360 }
 0x268   :  { %v1848_v30 = vpop.eup %1847 }
 0x269   :  { %v653_v33 = vmul.f32 %v1848_v30, %v1846_v21 }
 0x26b   :  { %1750 = vmatmul.mubr.msk.f32.vlgmr.msra.gmra.mrb[4].mxu0 %vm124_vm2, %v653_v33 }
 0x26c   :  { %1758 = vmatpush3.xpose.msk.msra.mxu0 %vm124_vm2, %v821_v31  ;;  %1759 = vmatprep.mubr.msk.f32.mxu0 %vm1870_vm1, %v1869_v8 }
 0x26d   :  { %1767 = vmatprep.subr.mxu0 %v1869_v8 }
 0x26f   :  { %1760 = vmatmul.mubr.msk.f32.vlgmr.msra.gmra.mrb[6].mxu0 %vm124_vm2, %v819_v34 }
 0x270   :  { %1768 = vmatpush3.msra.mxu0 %v1009_v35  ;;  %1769 = vmatprep.mubr.msk.f32.mxu0 %vm1870_vm1, %v1869_v8 }
 0x271   :  { %1777 = vmatprep.subr.mxu0 %v1869_v8 }
 0x2c6   :  { %v2009_v36 = vpop.f32.mrb[4].mxu1 }
 0x2c7   :  { %v1731_v37 = vpop.f32.mrb[5].mxu1 }
 0x2ca   :  { %v2011_v38 = vpop.f32.mrb[6].mxu1 }
 0x2cb   :  { %v1736_v39 = vpop.f32.mrb[7].mxu1 }
 0x2d1   :  { %v614_v40 = vpop.f32.mrb[8].mxu1 }
 0x2d2   :  { %v615_v41 = vadd.f32 %v614_v40, %v1974_v25  ;;  %v1746_v42 = vpop.f32.mrb[9].mxu1 }
 0x2d4   :  { %v625_v43 = vsel %vm124_vm2, %v615_v41, -inf }
 0x2d5   :  { %v626_v44 = vrot.slane %v625_v43, 4 }
 0x2d7   :  { %v627_v45 = vmax.f32 %v625_v43, %v626_v44 }
 0x2d9   :  { %v628_v46 = vrot.slane %v627_v45, 2 }
 0x2db   :  { %v629_v47 = vmax.f32 %v627_v45, %v628_v46 }
 0x2dd   :  { %v630_v48 = vrot.slane %v629_v47, 1 }
 0x2df   :  { %v631_v49 = vmax.f32 %v629_v47, %v630_v48 }
 0x2e1   :  { %v633_v50 = vsub.f32 %v615_v41, %v631_v49 }
 0x2e3   :  { %v636_v51 = vmul.f32 1.442695, %v633_v50 }
 0x2e5   :  { %1849 = vpow2.f32 %v636_v51 }
 0x2ef   :  { %v1850_v52 = vpop.eup %1849 }
 0x2f0   :  { %v645_v53 = vsel %vm124_vm2, %v1850_v52, 0.0 }
 0x2f1   :  { %v646_v54 = vrot.slane %v645_v53, 4 }
 0x2f3   :  { %v647_v55 = vadd.f32 %v646_v54, %v645_v53 }
 0x2f5   :  { %v648_v56 = vrot.slane %v647_v55, 2 }
 0x2f7   :  { %v649_v57 = vadd.f32 %v648_v56, %v647_v55  ;;  %v1437_v56 = vpop.permute.xlu0 %1436 }
 0x2f9   :  { %v650_v58 = vrot.slane %v649_v57, 1 }
 0x2fb   :  { %v651_v59 = vadd.f32 %v650_v58, %v649_v57 }
 0x2fd   :  { %1851 = vrcp.f32 %v651_v59 }
 0x307   :  { %v1852_v60 = vpop.eup %1851 }
 0x308   :  { %v655_v61 = vmul.f32 %v1852_v60, %v1850_v52 }
 0x30a   :  { %1755 = vmatmul.mubr.msk.f32.vlgmr.msra.gmra.mrb[10].mxu1 %vm124_vm2, %v655_v61 }
 0x30b   :  { %1763 = vmatpush3.xpose.msk.msra.mxu1 %vm124_vm2, %v897_v32  ;;  %1764 = vmatprep.mubr.msk.f32.mxu1 %vm1870_vm1, %v1869_v8 }
 0x30c   :  { %1772 = vmatprep.subr.mxu1 %v1869_v8 }
 0x30e   :  { %1765 = vmatmul.mubr.msk.f32.vlgmr.msra.gmra.mrb[12].mxu1 %vm124_vm2, %v819_v34 }
 0x30f   :  { %1773 = vmatpush3.msra.mxu1 %v1085_v62  ;;  %1774 = vmatprep.mubr.msk.f32.mxu1 %vm1870_vm1, %v1869_v8 }
 0x310   :  { %1782 = vmatprep.subr.mxu1 %v1869_v8 }
 0x33e   :  { %v728_v63 = vpop.f32.mrb[4].mxu0 }
 0x33f   :  { %810 = vrot.lane.b32.xlu1 %v728_v63, %s1879_s16  ;;  %v1751_v0 = vpop.f32.mrb[5].mxu0 }
 0x342   :  { %v892_v1 = vpop.f32.mrb[6].mxu0 }
 0x343   :  { %v893_v2 = vadd.f32 %v892_v1, %v1974_v25  ;;  %v1761_v3 = vpop.f32.mrb[7].mxu0 }
 0x345   :  { %v970_v4 = vsel %vm124_vm2, %v893_v2, -inf }
 0x346   :  { %v971_v5 = vrot.slane %v970_v4, 4 }
 0x348   :  { %v972_v6 = vmax.f32 %v970_v4, %v971_v5 }
 0x34a   :  { %v973_v7 = vrot.slane %v972_v6, 2 }
 0x34c   :  { %v974_v9 = vmax.f32 %v972_v6, %v973_v7 }
 0x34e   :  { %v975_v10 = vrot.slane %v974_v9, 1 }
 0x350   :  { %v976_v11 = vmax.f32 %v974_v9, %v975_v10 }
 0x352   :  { %v984_v13 = vsub.f32 %v893_v2, %v976_v11 }
 0x354   :  { %v986_v14 = vmul.f32 1.442695, %v984_v13 }
 0x356   :  { %1853 = vpow2.f32 %v986_v14 }
 0x360   :  { %v1854_v15 = vpop.eup %1853 }
 0x361   :  { %v990_v16 = vsel %vm124_vm2, %v1854_v15, 0.0 }
 0x362   :  { %v991_v17 = vrot.slane %v990_v16, 4 }
 0x364   :  { %v992_v18 = vadd.f32 %v991_v17, %v990_v16 }
 0x366   :  { %v993_v19 = vrot.slane %v992_v18, 2 }
 0x368   :  { %v994_v20 = vadd.f32 %v993_v19, %v992_v18 }
 0x36a   :  { %v995_v21 = vrot.slane %v994_v20, 1 }
 0x36c   :  { %v996_v22 = vadd.f32 %v995_v21, %v994_v20 }
 0x36e   :  { %1855 = vrcp.f32 %v996_v22 }
 0x378   :  { %v1856_v23 = vpop.eup %1855 }
 0x379   :  { %v1005_v27 = vmul.f32 %v1856_v23, %v1854_v15 }
 0x37b   :  { %1770 = vmatmul.mubr.msk.f32.vlgmr.msra.gmra.mrb[8].mxu0 %vm124_vm2, %v1005_v27 }
 0x37c   :  { %1778 = vmatpush3.xpose.msk.msra.mxu0 %vm124_vm2, %v1173_v24  ;;  %1779 = vmatprep.mubr.msk.f32.mxu0 %vm1870_vm1, %v1869_v8 }
 0x37d   :  { %1787 = vmatprep.subr.mxu0 %v1869_v8 }
 0x37f   :  { %1780 = vmatmul.mubr.msk.f32.vlgmr.msra.gmra.mrb[10].mxu0 %vm124_vm2, %v1171_v28 }
 0x380   :  { %1788 = vmatpush3.msra.mxu0 %v1361_v29  ;;  %1789 = vmatprep.mubr.msk.f32.mxu0 %vm1870_vm1, %v1869_v8 }
 0x3dd   :  { %v804_v30 = vpop.f32.mrb[10].mxu1 }
 0x3de   :  { %812 = vrot.lane.b32.xlu0 %v804_v30, %s1879_s16  ;;  %v1756_v31 = vpop.f32.mrb[11].mxu1 }
 0x3e1   :  { %v966_v32 = vpop.f32.mrb[12].mxu1 }
 0x3e2   :  { %v967_v33 = vadd.f32 %v966_v32, %v1974_v25  ;;  %v1766_v34 = vpop.f32.mrb[13].mxu1 }
 0x3e4   :  { %v977_v35 = vsel %vm124_vm2, %v967_v33, -inf }
 0x3e5   :  { %v978_v37 = vrot.slane %v977_v35, 4 }
 0x3e7   :  { %v979_v39 = vmax.f32 %v977_v35, %v978_v37 }
 0x3e9   :  { %v980_v40 = vrot.slane %v979_v39, 2 }
 0x3eb   :  { %v981_v41 = vmax.f32 %v979_v39, %v980_v40 }
 0x3ed   :  { %v982_v42 = vrot.slane %v981_v41, 1 }
 0x3ef   :  { %v983_v43 = vmax.f32 %v981_v41, %v982_v42 }
 0x3f1   :  { %v985_v44 = vsub.f32 %v967_v33, %v983_v43 }
 0x3f3   :  { %v988_v45 = vmul.f32 1.442695, %v985_v44 }
 0x3f5   :  { %1857 = vpow2.f32 %v988_v45 }
 0x3ff   :  { %v1858_v46 = vpop.eup %1857 }
 0x400   :  { %v997_v47 = vsel %vm124_vm2, %v1858_v46, 0.0 }
 0x401   :  { %v998_v48 = vrot.slane %v997_v47, 4 }
 0x403   :  { %v999_v49 = vadd.f32 %v998_v48, %v997_v47  ;;  %v1531_v47 = vld [vmem:[%s2102_s4 + $0x8] sm:$0xff]  ;;  %v1532_v48 = vld [vmem:[%s2102_s4 + $0x10] sm:$0xff] }
 0x405   :  { %v1000_v50 = vrot.slane %v999_v49, 2 }
 0x407   :  { %v1001_v51 = vadd.f32 %v1000_v50, %v999_v49  ;;  %v1533_v50 = vld [vmem:[%s2102_s4 + $0x18] sm:$0xff] }
 0x409   :  { %v1002_v52 = vrot.slane %v1001_v51, 1 }
 0x40b   :  { %v1003_v53 = vadd.f32 %v1002_v52, %v1001_v51  ;;  %v1820_v51 = vpack.c.bf16 %v1533_v50, %v1532_v48  ;;  %v811_v52 = vpop.permute.xlu1 %810 }
 0x40d   :  { %1859 = vrcp.f32 %v1003_v53 }
 0x417   :  { %v1860_v54 = vpop.eup %1859 }
 0x418   :  { %v1007_v55 = vmul.f32 %v1860_v54, %v1858_v46  ;;  %v1530_v46 = vld [vmem:[%s2102_s4] sm:$0xff]  ;;  %v816_v54 = vadd.f32 %v811_v52, %v1949_v12 }
 0x419   :  { %v1816_v49 = vpack.c.bf16 %v1531_v47, %v1530_v46 }
 0x41a   :  { %1775 = vmatmul.mubr.msk.f32.vlgmr.msra.gmra.mrb[14].mxu1 %vm124_vm2, %v1007_v55 }
 0x41b   :  { %1783 = vmatpush3.xpose.msk.msra.mxu1 %vm124_vm2, %v1249_v26  ;;  %1784 = vmatprep.mubr.msk.f32.mxu1 %vm1870_vm1, %v1869_v8 }
 0x41c   :  { %1792 = vmatprep.subr.mxu1 %v1869_v8  ;;  %1817 = vmatprep.subr.bf16.mxu0 %v1816_v49 }
 0x41e   :  { %1785 = vmatmul.mubr.msk.f32.vlgmr.msra.gmra.mrb[16].mxu1 %vm124_vm2, %v1171_v28 }
 0x41f   :  { %1793 = vmatpush3.msra.mxu1 %v1437_v56  ;;  %1794 = vmatprep.mubr.msk.f32.mxu1 %vm1870_vm1, %v1869_v8  ;;  %v464_v56 = vadd.f32 %v2009_v36, %v1949_v12 }
 0x44e   :  { %v1080_v57 = vpop.f32.mrb[8].mxu0 }
 0x44f   :  { %1162 = vrot.lane.b32.xlu1 %v1080_v57, %s1880_s17  ;;  %v1771_v58 = vpop.f32.mrb[9].mxu0 }
 0x450   :  { %v1522_v58 = vsel %vm124_vm2, %v464_v56, %v816_v54 }
 0x452   :  { %v1244_v59 = vpop.f32.mrb[10].mxu0 }
 0x453   :  { %v1245_v60 = vadd.f32 %v1244_v59, %v1974_v25  ;;  %v1781_v61 = vpop.f32.mrb[11].mxu0 }
 0x455   :  { %v1322_v62 = vsel %vm124_vm2, %v1245_v60, -inf }
 0x456   :  { %v1323_v63 = vrot.slane %v1322_v62, 4 }
 0x458   :  { %v1324_v0 = vmax.f32 %v1322_v62, %v1323_v63 }
 0x45a   :  { %v1325_v1 = vrot.slane %v1324_v0, 2 }
 0x45c   :  { %v1326_v2 = vmax.f32 %v1324_v0, %v1325_v1  ;;  %v813_v0 = vpop.permute.xlu0 %812 }
 0x45d   :  { %v817_v36 = vadd.f32 %v813_v0, %v1949_v12 }
 0x45e   :  { %v1327_v3 = vrot.slane %v1326_v2, 1 }
 0x460   :  { %v1328_v4 = vmax.f32 %v1326_v2, %v1327_v3  ;;  %v465_v3 = vadd.f32 %v2011_v38, %v1949_v12 }
 0x462   :  { %v1336_v5 = vsub.f32 %v1245_v60, %v1328_v4 }
 0x464   :  { %v1338_v6 = vmul.f32 1.442695, %v1336_v5  ;;  %v1523_v5 = vsel %vm124_vm2, %v465_v3, %v817_v36 }
 0x466   :  { %1861 = vpow2.f32 %v1338_v6 }
 0x470   :  { %v1862_v8 = vpop.eup %1861 }
 0x471   :  { %v1342_v7 = vsel %vm124_vm2, %v1862_v8, 0.0 }
 0x472   :  { %v1343_v9 = vrot.slane %v1342_v7, 4 }
 0x474   :  { %v1344_v10 = vadd.f32 %v1343_v9, %v1342_v7  ;;  %v1659_v9 = vld [vmem:[%s2103_s5] ss:$0 sm:$0xff] }
 0x476   :  { %v1345_v11 = vrot.slane %v1344_v10, 2 }
 0x478   :  { %v1346_v13 = vadd.f32 %v1345_v11, %v1344_v10 }
 0x47a   :  { %v1347_v14 = vrot.slane %v1346_v13, 1 }
 0x47c   :  { %v1348_v15 = vadd.f32 %v1347_v14, %v1346_v13 }
 0x47e   :  { %1863 = vrcp.f32 %v1348_v15 }
 0x488   :  { %v1864_v16 = vpop.eup %1863 }
 0x489   :  { %v1357_v17 = vmul.f32 %v1864_v16, %v1862_v8 }
 0x48b   :  { %1790 = vmatmul.mubr.msk.f32.vlgmr.msra.gmra.mrb[12].mxu0 %vm124_vm2, %v1357_v17 }
 0x48c   :  { %1819 = vmatpush3.bf16.msra.mxu0 %v1816_v49 }
 0x48d   :  { %1821 = vmatprep.subr.bf16.mxu0 %v1820_v51 }
 0x490   :  { %1823 = vmatpush3.bf16.msra.mxu0 %v1820_v51 }
 0x4c1   :  { %v1163_v53 = vpop.permute.xlu1 %1162 }
 0x4c2   :  { %v1168_v55 = vadd.f32 %v1163_v53, %v1949_v12 }
 0x4c4   :  { %v1525_v60 = vsel %vm1524_vm4, %v1522_v58, %v1168_v55 }
 0x4ed   :  { %v1156_v18 = vpop.f32.mrb[14].mxu1 }
 0x4ee   :  { %1164 = vrot.lane.b32.xlu0 %v1156_v18, %s1880_s17  ;;  %v1776_v19 = vpop.f32.mrb[15].mxu1 }
 0x4f1   :  { %v1318_v20 = vpop.f32.mrb[16].mxu1 }
 0x4f2   :  { %v1319_v21 = vadd.f32 %v1318_v20, %v1974_v25  ;;  %v1786_v22 = vpop.f32.mrb[17].mxu1 }
 0x4f4   :  { %v1329_v23 = vsel %vm124_vm2, %v1319_v21, -inf }
 0x4f5   :  { %v1330_v24 = vrot.slane %v1329_v23, 4 }
 0x4f7   :  { %v1331_v26 = vmax.f32 %v1329_v23, %v1330_v24 }
 0x4f9   :  { %v1332_v27 = vrot.slane %v1331_v26, 2 }
 0x4fb   :  { %v1333_v28 = vmax.f32 %v1331_v26, %v1332_v27 }
 0x4fd   :  { %v1334_v29 = vrot.slane %v1333_v28, 1 }
 0x4ff   :  { %v1335_v30 = vmax.f32 %v1333_v28, %v1334_v29 }
 0x501   :  { %v1337_v31 = vsub.f32 %v1319_v21, %v1335_v30 }
 0x503   :  { %v1340_v32 = vmul.f32 1.442695, %v1337_v31 }
 0x505   :  { %1865 = vpow2.f32 %v1340_v32 }
 0x50f   :  { %v1866_v33 = vpop.eup %1865 }
 0x510   :  { %v1349_v34 = vsel %vm124_vm2, %v1866_v33, 0.0 }
 0x511   :  { %v1350_v35 = vrot.slane %v1349_v34, 4 }
 0x513   :  { %v1351_v37 = vadd.f32 %v1350_v35, %v1349_v34 }
 0x515   :  { %v1352_v39 = vrot.slane %v1351_v37, 2 }
 0x517   :  { %v1353_v40 = vadd.f32 %v1352_v39, %v1351_v37 }
 0x519   :  { %v1354_v25 = vrot.slane %v1353_v40, 1 }
 0x51b   :  { %v1355_v41 = vadd.f32 %v1354_v25, %v1353_v40 }
 0x51d   :  { %1867 = vrcp.f32 %v1355_v41 }
 0x527   :  { %v1868_v42 = vpop.eup %1867 }
 0x528   :  { %v1359_v43 = vmul.f32 %v1868_v42, %v1866_v33 }
 0x52a   :  { %1795 = vmatmul.mubr.msk.f32.vlgmr.msra.gmra.mrb[18].mxu1 %vm124_vm2, %v1359_v43 }
 0x55e   :  { %v1432_v44 = vpop.f32.mrb[12].mxu0 }
 0x55f   :  { %1514 = vrot.lane.b32.xlu1 %v1432_v44, %s1881_s18  ;;  %v1791_v45 = vpop.f32.mrb[13].mxu0 }
 0x560   :  { %v1165_v1 = vpop.permute.xlu0 %1164 }
 0x561   :  { %v1169_v2 = vadd.f32 %v1165_v1, %v1949_v12 }
 0x563   :  { %v1526_v8 = vsel %vm1524_vm4, %v1523_v5, %v1169_v2 }
 0x5d1   :  { %v1515_v57 = vpop.permute.xlu1 %1514 }
 0x5d2   :  { %v1520_v59 = vadd.f32 %v1515_v57, %v1949_v12 }
 0x5d4   :  { %v1528_v61 = vsel %vm1527_vm5, %v1525_v60, %v1520_v59 }
 0x5d5   :  { %1805 = vmatprep.mubr.msk.f32.mxu0 %vm36_vm0, %v1528_v61 }
 0x5fd   :  { %v1508_v62 = vpop.f32.mrb[18].mxu1 }
 0x5fe   :  { %1516 = vrot.lane.b32.xlu0 %v1508_v62, %s1881_s18  ;;  %v1796_v63 = vpop.f32.mrb[19].mxu1 }
 0x670   :  { %v1517_v4 = vpop.permute.xlu0 %1516 }
 0x671   :  { %v1521_v6 = vadd.f32 %v1517_v4, %v1949_v12 }
 0x673   :  { %v1529_v7 = vsel %vm1527_vm5, %v1526_v8, %v1521_v6 }
 0x674   :  { %1806 = vmatmul.mubr.msk.f32.vlgmr.msra.gmra.mrb[14].mxu0 %vm36_vm0, %v1529_v7 }
 0x747   :  { %v1807_v10 = vpop.f32.mrb[14].mxu0 }
 0x748   :  { %v1619_v11 = vadd.f32 %v1807_v10, %v1659_v9  ;;  %v1613_v13 = vpop.f32.mrb[15].mxu0 }
 0x749   :  { %v1614_v14 = vadd.f32 %v1659_v9, %v1613_v13 }
 0x74a   :  { %v1623_v38 = vmax.f32 %v1619_v11, 0.0 }
 0x74b   :  { %v1622_v15 = vmax.f32 %v1614_v14, 0.0 }
 0x74c   :  { %v1625_v16 = vadd.f32 %v1623_v38, %v1529_v7 }
 0x74d   :  { %v1624_v17 = vadd.f32 %v1622_v15, %v1528_v61 }
 0x74e   :  { %1627 = vst.msk [vmem:[%s2104_s6 + $0x8] sm:$0xff] %vm36_vm0, %v1625_v16 }
 0x74f   :  { %1626 = vst.msk [vmem:[%s2104_s6] sm:$0xff] %vm36_vm0, %v1624_v17 }

</bundles_post_ra>
